<compile_context>
chip_gen: v5e
topology: v5e:2x2
jax: 0.10.0
libtpu: 0.0.40
codegen_flags: <defaults>
</compile_context>

<pallas_src>
import jax
import jax.numpy as jnp
from jax.experimental import pallas as pl
from jax.experimental.pallas import tpu as pltpu

NUM_INPUTS = 16          # discriminator input features (e.g. state-action dim)
H1 = 256                 # hidden_size[0] (module default)
H2 = 256                 # hidden_size[1] (module default)
BATCH = 256              # demo batch (multiple of TILE_B)
TILE_B = 128             # batch tile: multiple of 128 (v5e MXU); 256 also fits v6e/v7x
OUT_LANES = 128          # lane-dense output block; wrapper slices [:, :1]

# ---- packed bf16 parameter slab (row offsets are multiples of 16 = bf16 pack) ----
SLAB_COLS = 256                          # = H1 = H2 (lane-dense, multiple of 128)
W1_OFF = 0                               # rows [  0,  16) : W1 [16, 256]
B1_OFF = 16                              # row   16        : b1 (rows 16..31 reserved)
W2_OFF = 32                              # rows [ 32, 288) : W2 [256, 256]
B2_OFF = 288                             # row  288        : b2 (rows 288..303 reserved)
W3_OFF = 304                             # row  304        : w3^T as one [1,256] row
B3_OFF = 305                             # row  305        : b3 broadcast across lanes
SLAB_ROWS = 320                          # multiple of 16; 320*256*2 B = 160 KiB


def _disc_kernel(x_ref, slab_ref, out_ref):
    """One TILE_B batch tile of the discriminator forward.

    Slab is VMEM-resident across all grid steps (its index_map is constant)."""
    x = x_ref[...].astype(jnp.bfloat16)                        # [TB, 16]

    # Static, tile-aligned slices of the packed bf16 slab (free views).
    w1 = slab_ref[W1_OFF:W1_OFF + NUM_INPUTS, :]               # [16, 256] bf16
    b1 = slab_ref[B1_OFF:B1_OFF + 1, :].astype(jnp.float32)    # [1, 256]
    w2 = slab_ref[W2_OFF:W2_OFF + H1, :]                       # [256, 256] bf16
    b2 = slab_ref[B2_OFF:B2_OFF + 1, :].astype(jnp.float32)    # [1, 256]
    w3 = slab_ref[W3_OFF:W3_OFF + 1, :].astype(jnp.float32)    # [1, 256]  (w3 transposed)
    b3_row = slab_ref[B3_OFF:B3_OFF + 1, :].astype(jnp.float32)
    b3 = b3_row[:, 0:1]                                        # [1, 1]

    # Two MXU matmuls: bf16 inputs, f32 accumulation; activations in f32.
    h = jnp.tanh(jnp.dot(x, w1, preferred_element_type=jnp.float32) + b1)        # [TB,256] f32
    h = jnp.tanh(jnp.dot(h.astype(jnp.bfloat16), w2,
                         preferred_element_type=jnp.float32) + b2)               # [TB,256] f32

    # Final [256 -> 1] layer as VPU multiply + XLU lane reduce (no padded MXU push).
    logit = jnp.sum(h * w3, axis=-1, keepdims=True) + b3                         # [TB, 1]

    # sigmoid(x) = 1 / (1 + exp(-x)); reciprocal on the EUP slot.
    prob = pl.reciprocal(1.0 + jnp.exp(-logit), approx=True)                     # [TB, 1]

    # Lane-dense output store; wrapper slices lane 0.
    out_ref[...] = jnp.broadcast_to(prob, out_ref.shape)


def discriminator_forward(x, packed_slab, *, tile_b=TILE_B):
    B = x.shape[0]
    tb = min(tile_b, B)
    n_tiles = pl.cdiv(B, tb)
    Bp = n_tiles * tb
    if Bp != B:
        x = jnp.pad(x, ((0, Bp - B), (0, 0)))

    cost = pl.CostEstimate(
        flops=2 * Bp * (NUM_INPUTS * H1 + H1 * H2 + H2),       # two matmuls + final reduce
        transcendentals=Bp * (H1 + H2 + 2),                    # tanh, tanh, exp + recip
        bytes_accessed=4 * Bp * NUM_INPUTS                     # x (f32)
                       + 2 * SLAB_ROWS * SLAB_COLS             # slab (bf16, DMA'd once)
                       + 4 * Bp * OUT_LANES,                   # lane-dense output (f32)
    )

    out = pl.pallas_call(
        _disc_kernel,
        out_shape=jax.ShapeDtypeStruct((Bp, OUT_LANES), jnp.float32),
        grid_spec=pltpu.PrefetchScalarGridSpec(
            num_scalar_prefetch=0,
            grid=(n_tiles,),
            in_specs=[
                pl.BlockSpec((tb, NUM_INPUTS), lambda i: (i, 0)),
                # Constant block index -> slab DMA'd once, VMEM-resident for all steps.
                pl.BlockSpec((SLAB_ROWS, SLAB_COLS), lambda i: (0, 0)),
            ],
            out_specs=pl.BlockSpec((tb, OUT_LANES), lambda i: (i, 0)),
        ),
        compiler_params=pltpu.CompilerParams(
            dimension_semantics=("parallel",),                 # v7x: shard batch over 2 TCs
        ),
        cost_estimate=cost,
    )(x, packed_slab)

    return out[:B, :1]


def init_discriminator_params(key, num_inputs, hidden_size):
    """nn.Linear default init U(-1/sqrt(fan_in), 1/sqrt(fan_in)); weights stored [in, out].
    Replicates the module's `logic.weight *= 0.1; logic.bias *= 0.0`."""
    params = []
    last = num_inputs
    for nh in hidden_size:
        key, kw, kb = jax.random.split(key, 3)
        bound = 1.0 / (last ** 0.5)
        w = jax.random.uniform(kw, (last, nh), jnp.float32, -bound, bound)
        b = jax.random.uniform(kb, (nh,), jnp.float32, -bound, bound)
        params.append((w, b))
        last = nh
    key, kw, kb = jax.random.split(key, 3)
    bound = 1.0 / (last ** 0.5)
    w3 = jax.random.uniform(kw, (last, 1), jnp.float32, -bound, bound) * 0.1
    b3 = jnp.zeros((1,), jnp.float32)
    params.append((w3, b3))
    return params


def pack_params(params):
    """One-time packing of all weights/biases into a single lane-dense bf16 slab."""
    (w1, b1), (w2, b2), (w3, b3) = params
    slab = jnp.zeros((SLAB_ROWS, SLAB_COLS), jnp.float32)
    slab = slab.at[W1_OFF:W1_OFF + NUM_INPUTS, :].set(w1)
    slab = slab.at[B1_OFF, :].set(b1)
    slab = slab.at[W2_OFF:W2_OFF + H1, :].set(w2)
    slab = slab.at[B2_OFF, :].set(b2)
    slab = slab.at[W3_OFF, :].set(w3[:, 0])                    # w3 transposed into one row
    slab = slab.at[B3_OFF, :].set(b3[0])                       # scalar broadcast across lanes
    return slab.astype(jnp.bfloat16)


def _reference_forward(x, params):
    """Pure-JAX f32 reference mirroring the PyTorch forward semantics."""
    h = x
    for w, b in params[:-1]:
        h = jnp.tanh(h @ w + b)
    w, b = params[-1]
    logit = h @ w + b
    return 1.0 / (1.0 + jnp.exp(-logit))


if __name__ == "__main__":
    key = jax.random.PRNGKey(0)
    kx, kp = jax.random.split(key)

    x = jax.random.normal(kx, (BATCH, NUM_INPUTS), jnp.float32)
    params = init_discriminator_params(kp, NUM_INPUTS, (H1, H2))
    slab = pack_params(params)

    fwd = jax.jit(discriminator_forward)
    prob = fwd(x, slab)
    jax.block_until_ready(prob)

    ref = _reference_forward(x, params)
    assert prob.shape == (BATCH, 1)
    # bf16 weight slab (+ approx reciprocal) vs f32 reference: ~1e-4 abs error expected.
    assert jnp.allclose(prob, ref, atol=1e-2), "prob mismatch vs reference"
    assert bool(jnp.all(prob > 0.0)) and bool(jnp.all(prob < 1.0))

    print("KERNEL_OK")
</pallas_src>

<mosaic_0001>
module attributes {stable_mosaic.version = 11 : i64} {
  func.func @_disc_kernel(%arg0: i32, %arg1: memref<128x16xf32, #tpu.memory_space<vmem>>, %arg2: memref<320x256xbf16, #tpu.memory_space<vmem>>, %arg3: memref<128x128xf32, #tpu.memory_space<vmem>>) attributes {dimension_semantics = [#tpu.dimension_semantics<parallel>], iteration_bounds = array<i64: 2>, scalar_prefetch = 0 : i64, scratch_operands = 0 : i64, tpu.core_type = #tpu.core_type<tc>, window_params = [{transform_indices = @transform_0, window_bounds = array<i64: 128, 16>}, {pipeline_mode = #tpu.pipeline_mode<synchronous>, transform_indices = @transform_1, window_bounds = array<i64: 320, 256>}, {transform_indices = @transform_2, window_bounds = array<i64: 128, 128>}]} {
    %c0 = arith.constant 0 : index
    %c0_0 = arith.constant 0 : index
    %0 = vector.load %arg1[%c0, %c0_0] : memref<128x16xf32, #tpu.memory_space<vmem>>, vector<128x16xf32>
    %1 = arith.truncf %0 : vector<128x16xf32> to vector<128x16xbf16>
    %c0_1 = arith.constant 0 : index
    %c0_2 = arith.constant 0 : index
    %2 = vector.load %arg2[%c0_1, %c0_2] : memref<320x256xbf16, #tpu.memory_space<vmem>>, vector<16x256xbf16>
    %c16 = arith.constant 16 : index
    %c0_3 = arith.constant 0 : index
    %3 = vector.load %arg2[%c16, %c0_3] : memref<320x256xbf16, #tpu.memory_space<vmem>>, vector<1x256xbf16>
    %4 = arith.extf %3 : vector<1x256xbf16> to vector<1x256xf32>
    %c32 = arith.constant 32 : index
    %c0_4 = arith.constant 0 : index
    %5 = vector.load %arg2[%c32, %c0_4] : memref<320x256xbf16, #tpu.memory_space<vmem>>, vector<256x256xbf16>
    %c288 = arith.constant 288 : index
    %c0_5 = arith.constant 0 : index
    %6 = vector.load %arg2[%c288, %c0_5] : memref<320x256xbf16, #tpu.memory_space<vmem>>, vector<1x256xbf16>
    %7 = arith.extf %6 : vector<1x256xbf16> to vector<1x256xf32>
    %c304 = arith.constant 304 : index
    %c0_6 = arith.constant 0 : index
    %8 = vector.load %arg2[%c304, %c0_6] : memref<320x256xbf16, #tpu.memory_space<vmem>>, vector<1x256xbf16>
    %9 = arith.extf %8 : vector<1x256xbf16> to vector<1x256xf32>
    %c305 = arith.constant 305 : index
    %c0_7 = arith.constant 0 : index
    %10 = vector.load %arg2[%c305, %c0_7] : memref<320x256xbf16, #tpu.memory_space<vmem>>, vector<1x256xbf16>
    %11 = arith.extf %10 : vector<1x256xbf16> to vector<1x256xf32>
    %12 = vector.extract_strided_slice %11 {offsets = [0, 0], sizes = [1, 1], strides = [1, 1]} : vector<1x256xf32> to vector<1x1xf32>
    %cst = arith.constant dense<0.000000e+00> : vector<128x256xf32>
    %13 = tpu.matmul %1, %2, %cst {dimension_numbers = #tpu.dot_dimension_numbers<[1], [0], [0], [1], [0, 0, 1, 1], [], []>} : vector<128x16xbf16>, vector<16x256xbf16>, vector<128x256xf32> -> vector<128x256xf32>
    %14 = vector.broadcast %4 : vector<1x256xf32> to vector<128x256xf32>
    %15 = arith.addf %13, %14 : vector<128x256xf32>
    %16 = math.tanh %15 : vector<128x256xf32>
    %17 = arith.truncf %16 : vector<128x256xf32> to vector<128x256xbf16>
    %cst_8 = arith.constant dense<0.000000e+00> : vector<128x256xf32>
    %18 = tpu.matmul %17, %5, %cst_8 {dimension_numbers = #tpu.dot_dimension_numbers<[1], [0], [0], [1], [0, 0, 1, 1], [], []>} : vector<128x256xbf16>, vector<256x256xbf16>, vector<128x256xf32> -> vector<128x256xf32>
    %19 = vector.broadcast %7 : vector<1x256xf32> to vector<128x256xf32>
    %20 = arith.addf %18, %19 : vector<128x256xf32>
    %21 = math.tanh %20 : vector<128x256xf32>
    %22 = vector.broadcast %9 : vector<1x256xf32> to vector<128x256xf32>
    %23 = arith.mulf %21, %22 : vector<128x256xf32>
    %cst_9 = arith.constant dense<0.000000e+00> : vector<128xf32>
    %24 = vector.multi_reduction <add>, %23, %cst_9 [1] : vector<128x256xf32> to vector<128xf32>
    %25 = vector.shape_cast %24 : vector<128xf32> to vector<128x1xf32>
    %26 = vector.broadcast %12 : vector<1x1xf32> to vector<128x1xf32>
    %27 = arith.addf %25, %26 : vector<128x1xf32>
    %cst_10 = arith.constant 0.000000e+00 : f32
    %28 = vector.broadcast %cst_10 : f32 to vector<128x1xf32>
    %29 = arith.subf %28, %27 : vector<128x1xf32>
    %30 = math.exp %29 : vector<128x1xf32>
    %cst_11 = arith.constant 1.000000e+00 : f32
    %31 = vector.broadcast %cst_11 : f32 to vector<128x1xf32>
    %32 = arith.addf %31, %30 : vector<128x1xf32>
    %33 = tpu.reciprocal %32 {approx = true} : vector<128x1xf32> -> vector<128x1xf32>
    %34 = vector.shape_cast %33 : vector<128x1xf32> to vector<128x1xf32>
    %35 = vector.broadcast %34 : vector<128x1xf32> to vector<128x128xf32>
    %c0_12 = arith.constant 0 : index
    %c0_13 = arith.constant 0 : index
    %36 = vector.load %arg3[%c0_12, %c0_13] : memref<128x128xf32, #tpu.memory_space<vmem>>, vector<128x128xf32>
    tpu.vector_store %arg3[%c0_12, %c0_13], %35 {strides = array<i32>} : memref<128x128xf32, #tpu.memory_space<vmem>>, vector<128x128xf32>,
    return
  }
  func.func @transform_0(%arg0: i32) -> (i32, i32) {
    %c0_i32 = arith.constant 0 : i32
    %c0_i32_0 = arith.constant 0 : i32
    return %arg0, %c0_i32 : i32, i32
  }
  func.func @transform_1(%arg0: i32) -> (i32, i32) {
    %c0_i32 = arith.constant 0 : i32
    %c0_i32_0 = arith.constant 0 : i32
    %c0_i32_1 = arith.constant 0 : i32
    return %c0_i32, %c0_i32_0 : i32, i32
  }
  func.func @transform_2(%arg0: i32) -> (i32, i32) {
    %c0_i32 = arith.constant 0 : i32
    %c0_i32_0 = arith.constant 0 : i32
    return %arg0, %c0_i32 : i32, i32
  }
}

</mosaic_0001>

<bundles_post_ra>
// kernel: discriminator_forward.1
= control target key start
LH: loop header
LB: loop body
LE: loop exit
PB: predicated region body
PF: predicated region fallthrough
CT: control target
= control target key end

     0   :  { %7 = vsyncpa [#allocation3], 0  ;;  %s1635_s9 = smov 0   ;;  %s1872_s0 = inlined_call_operand.vmem [shape: f32[256,16], index: 0, kind: input, shape index: {}]   ;;  %s1873_s1 = inlined_call_operand.hbm [shape: bf16[320,256], index: 1, kind: input, shape index: {}]   ;;  %s1874_s2 = inlined_call_operand.vmem [shape: f32[256,128], index: 2, kind: output, shape index: {}]  }
   0x1 LB: > { %s102_s12 = sshll.u32 %s1873_s1, 4  ;;  %s1148_s13 = sadd.s32 4294967295, %s1614_s9   ;;  %s1614_s9 = sphi %s1635_s9, %s13_s9   ;;  %s103_s12 = int_to_ptr.hbm [resolvable:$true] %s102_s12 }
   0x2   : > { %p1150_p0 = scmp.ge.s32.totalorder %s1614_s9, 1  ;;  %p91_p1 = scmp.lt.s32.totalorder %s1614_s9, 3 }
   0x3   : > { %p1365_p2 = scmp.eq.s32.totalorder %s1148_s13, 0  ;;  %s1616_s14 = smov [#allocation2]  }
   0x4   : > { %p92_p3 = pnand %p1150_p0, %p91_p1  ;;  %s104_s15 = sshll.u32 %s1616_s14, 4  ;;  %s105_s15 = int_to_ptr.vmem [resolvable:$true] %s104_s15 }
   0x5   : > { %s1617_s16 = smov 128   ;;  %s1618_s17 = smov 8  }
   0x6   : > { %p1361_p4 = pneg %p92_p3  ;;  %129 = sbr.rel (%p92_p3) target bundleno = 703 (0x2bf), region = 28 }
   0x8   : > { %p1362_p5 = pnand %p1365_p2, %p1361_p4 }
   0xa   : > { %1364 = dma.hbm_to_vmem [thread:$0]  (!%p1362_p5), %s103_s12, 5120, %s105_s15, [#allocation3], %s1617_s16, %s1617_s16, %s1618_s17  }
   0xb   : > { %1609 = dma.done.wait (%p1365_p2), [#allocation3], 5120  }
   0xc   : > { %1611 = vsyncadd (%p1365_p2), [#allocation3], 4294962176  ;;  %s1155_s18 = sshll.u32 %s1148_s13, 4  ;;  %v1161_v0 = vld [vmem:[#allocation2] sm:$0xf]  ;;  %vm244_vm0 = vcmask 130048  }
   0xd   : > { %p153_p6 = scmp.lt.s32.totalorder %s1155_s18, 31  ;;  %v1314_v1 = vld [vmem:[#allocation2 + $0x4] sm:$0xf0]  ;;  %v1313_v2 = vld [vmem:[#allocation2 + $0x4] sm:$0xf] }
   0xe   : > { %v1162_v3 = vor.u32 %v1314_v1, %v1161_v0  ;;  %v1163_v4 = vld [vmem:[#allocation2 + $0x8] sm:$0xf0]  ;;  %v1241_v21 = vld [vmem:[#allocation2 + $0x90] sm:$0xf]  ;;  %v1330_v22 = vld [vmem:[#allocation2 + $0x94] sm:$0xf0] }
   0xf   : > { %s1876_s18 = smov (!%p153_p6, %s1155_s18), 31  ;;  %v1166_v7 = vor.u32 %v1313_v2, %v1163_v4  ;;  %v1242_v23 = vor.u32 %v1330_v22, %v1241_v21  ;;  %v1305_v24 = vld [vmem:[#allocation2 + $0x110] sm:$0xf]  ;;  %v1346_v25 = vld [vmem:[#allocation2 + $0x114] sm:$0xf0] }
  0x10   : > { %s1156_s19 = sshll.u32 %s1876_s18, 3  ;;  %276 = vmatpush.bf16.msra.mxu0 %v1162_v3  ;;  %1347 = vmatpush.bf16.msra.mxu2 %v1162_v3  ;;  %v1233_v26 = vld [vmem:[#allocation2 + $0x80] sm:$0xf]  ;;  %v1306_v27 = vor.u32 %v1346_v25, %v1305_v24  ;;  %v1328_v28 = vld [vmem:[#allocation2 + $0x84] sm:$0xf0] }
  0x11   : > { %s1654_s22 = scalar_lea.vmem %s1872_s0, %s1156_s19  ;;  %325 = vmatpush.bf16.msra.mxu1 %v1166_v7  ;;  %1348 = vmatpush.bf16.msra.mxu3 %v1166_v7  ;;  %v1329_v29 = vld [vmem:[#allocation2 + $0x94] sm:$0xf]  ;;  %v1243_v30 = vld [vmem:[#allocation2 + $0x98] sm:$0xf0]  ;;  %v1234_v31 = vor.u32 %v1328_v28, %v1233_v26  ;;  %v1297_v35 = vld [vmem:[#allocation2 + $0x100] sm:$0xf]  ;;  %s1850_s25 = scalar_lea.vmem %s1874_s2, %s1156_s19 }
  0x12   : > { %v165_v5 = vld [vmem:[%s1654_s22] sm:$0xff]  ;;  %v166_v6 = vld [vmem:[%s1654_s22 + $0x8] sm:$0xff]  ;;  %v167_v9 = vld [vmem:[%s1654_s22 + $0x10] sm:$0xff]  ;;  %v1678_v32 = vor.u32 %v1329_v29, %v1243_v30 }
  0x13   : > { %v181_v8 = vpack.c.bf16 %v166_v6, %v165_v5  ;;  %v168_v10 = vld [vmem:[%s1654_s22 + $0x18] sm:$0xff]  ;;  %v173_v12 = vld [vmem:[%s1654_s22 + $0x40] sm:$0xff]  ;;  %v174_v13 = vld [vmem:[%s1654_s22 + $0x48] sm:$0xff] }
  0x14   : > { %v182_v11 = vpack.c.bf16 %v168_v10, %v167_v9  ;;  %v1666_v14 = vpack.c.bf16 %v174_v13, %v173_v12  ;;  %v169_v15 = vld [vmem:[%s1654_s22 + $0x20] sm:$0xff]  ;;  %v170_v16 = vld [vmem:[%s1654_s22 + $0x28] sm:$0xff]  ;;  %v175_v18 = vld [vmem:[%s1654_s22 + $0x50] sm:$0xff]  ;;  %577 = vmatpush.bf16.msrb.mxu2 %v1242_v23  ;;  %675 = vmatpush.bf16.msrb.mxu0 %v1678_v32 }
  0x15   : > { %1167 = vmatmul.msk.bf16.vlgmr.msra.gmra.mxu0 %vm244_vm0, %v181_v8  ;;  %1175 = vmatmul.msk.bf16.vlgmr.msra.gmra.mxu1 %vm244_vm0, %v181_v8  ;;  %v183_v17 = vpack.c.bf16 %v170_v16, %v169_v15  ;;  %v176_v19 = vld [vmem:[%s1654_s22 + $0x58] sm:$0xff]  ;;  %v1345_v33 = vld [vmem:[#allocation2 + $0x114] sm:$0xf]  ;;  %v1344_v37 = vld [vmem:[#allocation2 + $0x104] sm:$0xf0] }
  0x16   : > { %1179 = vmatmul.msk.bf16.vlgmr.msra.gmra.mxu3 %vm244_vm0, %v1666_v14  ;;  %v186_v20 = vpack.c.bf16 %v176_v19, %v175_v18  ;;  %v1307_v34 = vld [vmem:[#allocation2 + $0x118] sm:$0xf0]  ;;  %v1225_v38 = vld [vmem:[#allocation2 + $0x70] sm:$0xf]  ;;  %v1326_v39 = vld [vmem:[#allocation2 + $0x74] sm:$0xf0]  ;;  %v1298_v40 = vor.u32 %v1344_v37, %v1297_v35 }
  0x17   : > { %626 = vmatpush.bf16.msrb.mxu3 %v1306_v27  ;;  %v1310_v36 = vor.u32 %v1345_v33, %v1307_v34  ;;  %v1327_v41 = vld [vmem:[#allocation2 + $0x84] sm:$0xf]  ;;  %v1235_v42 = vld [vmem:[#allocation2 + $0x88] sm:$0xf0]  ;;  %v171_v44 = vld [vmem:[%s1654_s22 + $0x30] sm:$0xff]  ;;  %v1226_v48 = vor.u32 %v1326_v39, %v1225_v38 }
  0x18   : > { %1172 = vmatmul.msk.bf16.vlgmr.msra.gmra.mxu2 %vm244_vm0, %v186_v20  ;;  %v1343_v43 = vld [vmem:[#allocation2 + $0x104] sm:$0xf]  ;;  %v172_v45 = vld [vmem:[%s1654_s22 + $0x38] sm:$0xff]  ;;  %v1683_v46 = vor.u32 %v1327_v41, %v1235_v42  ;;  %v1299_v47 = vld [vmem:[#allocation2 + $0x108] sm:$0xf0] }
  0x19   : > { %724 = vmatpush.bf16.msrb.mxu1 %v1310_v36  ;;  %578 = vmatpush.bf16.msrb.mxu2 %v1234_v31  ;;  %v1302_v49 = vor.u32 %v1343_v43, %v1299_v47  ;;  %v1217_v50 = vld [vmem:[#allocation2 + $0x60] sm:$0xf]  ;;  %v1289_v51 = vld [vmem:[#allocation2 + $0xf0] sm:$0xf]  ;;  %v1342_v52 = vld [vmem:[#allocation2 + $0xf4] sm:$0xf0]  ;;  %v184_v1 = vpack.c.bf16 %v172_v45, %v171_v44 }
  0x1a   : > { %v1324_v53 = vld [vmem:[#allocation2 + $0x64] sm:$0xf0]  ;;  %v1290_v54 = vor.u32 %v1342_v52, %v1289_v51  ;;  %v1341_v55 = vld [vmem:[#allocation2 + $0xf4] sm:$0xf]  ;;  %v1291_v56 = vld [vmem:[#allocation2 + $0xf8] sm:$0xf0]  ;;  %676 = vmatpush.bf16.msrb.mxu0 %v1683_v46 }
  0x1b   : > { %627 = vmatpush.bf16.msrb.mxu3 %v1298_v40  ;;  %v1325_v57 = vld [vmem:[#allocation2 + $0x74] sm:$0xf]  ;;  %v1227_v58 = vld [vmem:[#allocation2 + $0x78] sm:$0xf0]  ;;  %v1281_v59 = vld [vmem:[#allocation2 + $0xe0] sm:$0xf]  ;;  %v1294_v62 = vor.u32 %v1341_v55, %v1291_v56  ;;  %v1218_v2 = vor.u32 %v1324_v53, %v1217_v50 }
  0x1c   : > { %v177_v60 = vld [vmem:[%s1654_s22 + $0x60] sm:$0xff]  ;;  %v178_v61 = vld [vmem:[%s1654_s22 + $0x68] sm:$0xff]  ;;  %v1688_v63 = vor.u32 %v1325_v57, %v1227_v58  ;;  %v1209_v3 = vld [vmem:[#allocation2 + $0x50] sm:$0xf] }
  0x1d   : > { %725 = vmatpush.bf16.msrb.mxu1 %v1302_v49  ;;  %v1340_v0 = vld [vmem:[#allocation2 + $0xe4] sm:$0xf0]  ;;  %579 = vmatpush.bf16.msrb.mxu2 %v1226_v48  ;;  %v1322_v4 = vld [vmem:[#allocation2 + $0x54] sm:$0xf0]  ;;  %v187_v6 = vpack.c.bf16 %v178_v61, %v177_v60  ;;  %v179_v8 = vld [vmem:[%s1654_s22 + $0x70] sm:$0xff] }
  0x1e   : > { %v1282_v5 = vor.u32 %v1340_v0, %v1281_v59  ;;  %677 = vmatpush.bf16.msrb.mxu0 %v1688_v63  ;;  %v1210_v7 = vor.u32 %v1322_v4, %v1209_v3  ;;  %v180_v9 = vld [vmem:[%s1654_s22 + $0x78] sm:$0xff]  ;;  %v1219_v12 = vld [vmem:[#allocation2 + $0x68] sm:$0xf0]  ;;  %v1339_v15 = vld [vmem:[#allocation2 + $0xe4] sm:$0xf] }
  0x1f   : > { %628 = vmatpush.bf16.msrb.mxu3 %v1290_v54  ;;  %v188_v10 = vpack.c.bf16 %v180_v9, %v179_v8  ;;  %v1283_v16 = vld [vmem:[#allocation2 + $0xe8] sm:$0xf0]  ;;  %v1321_v18 = vld [vmem:[#allocation2 + $0x54] sm:$0xf]  ;;  %v1211_v19 = vld [vmem:[#allocation2 + $0x58] sm:$0xf0] }
  0x20   : > { %v1201_v21 = vld [vmem:[#allocation2 + $0x40] sm:$0xf]  ;;  %v1273_v22 = vld [vmem:[#allocation2 + $0xd0] sm:$0xf]  ;;  %v1338_v24 = vld [vmem:[#allocation2 + $0xd4] sm:$0xf0] }
  0x21   : > { %726 = vmatpush.bf16.msrb.mxu1 %v1294_v62  ;;  %580 = vmatpush.bf16.msrb.mxu2 %v1218_v2  ;;  %v1337_v25 = vld [vmem:[#allocation2 + $0xd4] sm:$0xf]  ;;  %v1274_v26 = vor.u32 %v1338_v24, %v1273_v22  ;;  %v1275_v27 = vld [vmem:[#allocation2 + $0xd8] sm:$0xf0]  ;;  %v1319_v28 = vld [vmem:[#allocation2 + $0x44] sm:$0xf] }
  0x22   : > { %v1203_v29 = vld [vmem:[#allocation2 + $0x48] sm:$0xf0]  ;;  %v1278_v30 = vor.u32 %v1337_v25, %v1275_v27  ;;  %v1265_v33 = vld [vmem:[#allocation2 + $0xc0] sm:$0xf]  ;;  %v1336_v34 = vld [vmem:[#allocation2 + $0xc4] sm:$0xf0] }
  0x23   : > { %629 = vmatpush.bf16.msrb.mxu3 %v1282_v5  ;;  %v1206_v31 = vor.u32 %v1319_v28, %v1203_v29  ;;  %v1335_v35 = vld [vmem:[#allocation2 + $0xc4] sm:$0xf]  ;;  %v1266_v36 = vor.u32 %v1336_v34, %v1265_v33  ;;  %v1267_v37 = vld [vmem:[#allocation2 + $0xc8] sm:$0xf0]  ;;  %v1193_v38 = vld [vmem:[#allocation2 + $0x30] sm:$0xf] }
  0x24   : > { %v1318_v39 = vld [vmem:[#allocation2 + $0x34] sm:$0xf0]  ;;  %v1270_v40 = vor.u32 %v1335_v35, %v1267_v37  ;;  %v1317_v41 = vld [vmem:[#allocation2 + $0x34] sm:$0xf]  ;;  %v1195_v43 = vld [vmem:[#allocation2 + $0x38] sm:$0xf0] }
  0x25   : > { %1168 = vmatmul.msk.bf16.gmra.mxu0 %vm244_vm0, %v182_v11  ;;  %1176 = vmatmul.msk.bf16.gmra.mxu1 %vm244_vm0, %v182_v11  ;;  %v1323_v11 = vld [vmem:[#allocation2 + $0x64] sm:$0xf]  ;;  %v1194_v42 = vor.u32 %v1318_v39, %v1193_v38  ;;  %v1198_v44 = vor.u32 %v1317_v41, %v1195_v43  ;;  %v1185_v45 = vld [vmem:[#allocation2 + $0x20] sm:$0xf]  ;;  %v1316_v47 = vld [vmem:[#allocation2 + $0x24] sm:$0xf0] }
  0x26   : > { %1180 = vmatmul.msk.bf16.gmra.mxu3 %vm244_vm0, %v186_v20  ;;  %581 = vmatpush.bf16.msrb.mxu2 %v1210_v7  ;;  %v1701_v13 = vor.u32 %v1323_v11, %v1219_v12  ;;  %v1704_v20 = vor.u32 %v1321_v18, %v1211_v19  ;;  %v1257_v48 = vld [vmem:[#allocation2 + $0xb0] sm:$0xf]  ;;  %v1186_v49 = vor.u32 %v1316_v47, %v1185_v45  ;;  %v1334_v50 = vld [vmem:[#allocation2 + $0xb4] sm:$0xf0]  ;;  %v1333_v51 = vld [vmem:[#allocation2 + $0xb4] sm:$0xf] }
  0x27   : > { %630 = vmatpush.bf16.msrb.mxu3 %v1274_v26  ;;  %v1259_v52 = vld [vmem:[#allocation2 + $0xb8] sm:$0xf0]  ;;  %v1258_v53 = vor.u32 %v1334_v50, %v1257_v48  ;;  %v1315_v55 = vld [vmem:[#allocation2 + $0x24] sm:$0xf]  ;;  %v1187_v56 = vld [vmem:[#allocation2 + $0x28] sm:$0xf0] }
  0x28   : > { %1173 = vmatmul.msk.bf16.gmra.mxu2 %vm244_vm0, %v187_v6  ;;  %678 = vmatpush.bf16.msrb.mxu0 %v1701_v13  ;;  %v1262_v54 = vor.u32 %v1333_v51, %v1259_v52  ;;  %v1190_v57 = vor.u32 %v1315_v55, %v1187_v56  ;;  %v1249_v58 = vld [vmem:[#allocation2 + $0xa0] sm:$0xf]  ;;  %v1332_v59 = vld [vmem:[#allocation2 + $0xa4] sm:$0xf0]  ;;  %v1331_v60 = vld [vmem:[#allocation2 + $0xa4] sm:$0xf] }
  0x29   : > { %v1250_v61 = vor.u32 %v1332_v59, %v1249_v58  ;;  %v1251_v62 = vld [vmem:[#allocation2 + $0xa8] sm:$0xf0] }
  0x2a   : > { %v1254_v0 = vor.u32 %v1331_v60, %v1251_v62 }
  0x2b   : > { %631 = vmatpush.bf16.msrb.mxu3 %v1266_v36 }
  0x2c   : > { %679 = vmatpush.bf16.msrb.mxu0 %v1704_v20 }
  0x2f   : > { %632 = vmatpush.bf16.msrb.mxu3 %v1258_v53 }
  0x30   : > { %680 = vmatpush.bf16.msrb.mxu0 %v1206_v31 }
  0x33   : > { %633 = vmatpush.bf16.msrb.mxu3 %v1250_v61 }
  0x34   : > { %681 = vmatpush.bf16.msrb.mxu0 %v1198_v44 }
  0x35   : > { %1169 = vmatmul.msk.bf16.gmra.mxu0 %vm244_vm0, %v183_v17  ;;  %1177 = vmatmul.msk.bf16.gmra.mxu1 %vm244_vm0, %v183_v17  ;;  %v1286_v17 = vor.u32 %v1339_v15, %v1283_v16 }
  0x36   : > { %1181 = vmatmul.msk.bf16.gmra.mxu3 %vm244_vm0, %v187_v6 }
  0x37   : > { %727 = vmatpush.bf16.msrb.mxu1 %v1286_v17 }
  0x38   : > { %1174 = vmatmul.msk.bf16.gmra.mxu2 %vm244_vm0, %v188_v10  ;;  %682 = vmatpush.bf16.msrb.mxu0 %v1190_v57 }
  0x3b   : > { %728 = vmatpush.bf16.msrb.mxu1 %v1278_v30 }
  0x3f   : > { %729 = vmatpush.bf16.msrb.mxu1 %v1270_v40 }
  0x43   : > { %730 = vmatpush.bf16.msrb.mxu1 %v1262_v54 }
  0x45   : > { %1170 = vmatmul.msk.bf16.gmra.mxu0 %vm244_vm0, %v184_v1  ;;  %1178 = vmatmul.msk.bf16.gmra.mxu1 %vm244_vm0, %v184_v1  ;;  %v191_v1 = vld [vmem:[#allocation2 + $0x10] sm:$0x11] }
  0x46   : > { %1182 = vmatmul.msk.bf16.gmra.mxu3 %vm244_vm0, %v188_v10  ;;  %v192_v2 = vunpack.c.l.bf16 %v191_v1  ;;  %v193_v3 = vunpack.c.h.bf16 %v191_v1 }
  0x47   : > { %731 = vmatpush.bf16.msrb.mxu1 %v1254_v0 }
  0x48   : > { %v1711_v5 = vperm.slane %v192_v2, 0  ;;  %v1713_v7 = vperm.slane %v193_v3, 0 }
  0x55   : > { %1171 = vmatmul.msk.bf16.gmra.mxu0 %vm244_vm0, %v1666_v14  ;;  %v1320_v14 = vld [vmem:[#allocation2 + $0x44] sm:$0xf0] }
  0x56   : > { %v1202_v23 = vor.u32 %v1320_v14, %v1201_v21 }
  0x58   : > { %582 = vmatpush.bf16.msrb.mxu2 %v1202_v23 }
  0x5c   : > { %583 = vmatpush.bf16.msrb.mxu2 %v1194_v42 }
  0x60   : > { %584 = vmatpush.bf16.msrb.mxu2 %v1186_v49 }
  0x64   : > { %1349 = vmatpush.bf16.msra.mxu2 %v1678_v32 }
  0x68   : > { %1350 = vmatpush.bf16.msra.mxu2 %v1683_v46 }
  0x6c   : > { %1351 = vmatpush.bf16.msra.mxu2 %v1688_v63 }
  0x70   : > { %1352 = vmatpush.bf16.msra.mxu2 %v1701_v13 }
  0x74   : > { %1353 = vmatpush.bf16.msra.mxu2 %v1704_v20 }
  0x78   : > { %1354 = vmatpush.bf16.msra.mxu2 %v1206_v31 }
  0x7c   : > { %1355 = vmatpush.bf16.msra.mxu2 %v1198_v44 }
  0x80   : > { %1356 = vmatpush.bf16.msra.mxu2 %v1190_v57 }
  0x92   : > { %v278_v4 = vpop.f32.mrf.mxu0  ;;  %v327_v6 = vpop.f32.mrf.mxu1 }
  0x93   : > { %v279_v32 = vadd.f32 %v278_v4, %v1711_v5  ;;  %v328_v8 = vadd.f32 %v327_v6, %v1713_v7 }
  0x95   : > { %1382 = vtanh.f32 %v279_v32 }
  0x96   : > { %1384 = vtanh.f32 %v328_v8 }
  0x99   : > { %v347_v40 = vpop.f32.mrf.mxu3 }
  0x9a   : > { %v280_v46 = vpop.f32.mrf.mxu0  ;;  %v329_v9 = vpop.f32.mrf.mxu1  ;;  %v348_v2 = vadd.f32 %v347_v40, %v1713_v7 }
  0x9b   : > { %v281_v63 = vadd.f32 %v280_v46, %v1711_v5  ;;  %v330_v10 = vadd.f32 %v329_v9, %v1713_v7  ;;  %v1383_v11 = vpop.eup %1382  ;;  %v303_v61 = vpop.f32.mrf.mxu2 }
  0x9c   : > { %v1385_v12 = vpop.eup %1384 }
  0x9d   : > { %1386 = vtanh.f32 %v281_v63 }
  0x9e   : > { %1388 = vtanh.f32 %v330_v10 }
  0xa1   : > { %v349_v51 = vpop.f32.mrf.mxu3 }
  0xa2   : > { %v283_v13 = vpop.f32.mrf.mxu0  ;;  %v332_v16 = vpop.f32.mrf.mxu1  ;;  %v350_v4 = vadd.f32 %v349_v51, %v1713_v7 }
  0xa3   : > { %v1387_v15 = vpop.eup %1386  ;;  %v284_v20 = vadd.f32 %v283_v13, %v1711_v5  ;;  %v333_v21 = vadd.f32 %v332_v16, %v1713_v7  ;;  %v305_v63 = vpop.f32.mrf.mxu2 }
  0xa4   : > { %v1389_v17 = vpop.eup %1388  ;;  %v399_v18 = vpack.c.bf16 %v1387_v15, %v1383_v11  ;;  %v304_v15 = vadd.f32 %v303_v61, %v1711_v5 }
  0xa5   : > { %v400_v19 = vpack.c.bf16 %v1389_v17, %v1385_v12  ;;  %1390 = vtanh.f32 %v284_v20 }
  0xa6   : > { %585 = vmatmul.bf16.vlgmr.msrb.gmra.mxu2 %v399_v18  ;;  %683 = vmatmul.bf16.vlgmr.msrb.gmra.mxu0 %v399_v18  ;;  %1392 = vtanh.f32 %v333_v21  ;;  %v306_v21 = vadd.f32 %v305_v63, %v1711_v5 }
  0xa7   : > { %634 = vmatmul.bf16.vlgmr.msrb.gmra.mxu3 %v400_v19  ;;  %732 = vmatmul.bf16.vlgmr.msrb.gmra.mxu1 %v400_v19 }
  0xa9   : > { %v352_v58 = vpop.f32.mrf.mxu3 }
  0xaa   : > { %v285_v14 = vpop.f32.mrf.mxu0  ;;  %v334_v23 = vpop.f32.mrf.mxu1  ;;  %v353_v17 = vadd.f32 %v352_v58, %v1713_v7 }
  0xab   : > { %v286_v22 = vadd.f32 %v285_v14, %v1711_v5  ;;  %v335_v24 = vadd.f32 %v334_v23, %v1713_v7  ;;  %v1391_v25 = vpop.eup %1390  ;;  %v308_v19 = vpop.f32.mrf.mxu2 }
  0xac   : > { %v1393_v26 = vpop.eup %1392 }
  0xad   : > { %1394 = vtanh.f32 %v286_v22 }
  0xae   : > { %1396 = vtanh.f32 %v335_v24 }
  0xb1   : > { %v354_v46 = vpop.f32.mrf.mxu3 }
  0xb2   : > { %v288_v27 = vpop.f32.mrf.mxu0  ;;  %v337_v29 = vpop.f32.mrf.mxu1  ;;  %v355_v20 = vadd.f32 %v354_v46, %v1713_v7 }
  0xb3   : > { %v1395_v28 = vpop.eup %1394  ;;  %v289_v34 = vadd.f32 %v288_v27, %v1711_v5  ;;  %v338_v35 = vadd.f32 %v337_v29, %v1713_v7 }
  0xb4   : > { %v1397_v30 = vpop.eup %1396  ;;  %v401_v31 = vpack.c.bf16 %v1395_v28, %v1391_v25  ;;  %v310_v25 = vpop.f32.mrf.mxu2  ;;  %v309_v28 = vadd.f32 %v308_v19, %v1711_v5 }
  0xb5   : > { %v402_v33 = vpack.c.bf16 %v1397_v30, %v1393_v26  ;;  %1398 = vtanh.f32 %v289_v34 }
  0xb6   : > { %590 = vmatmul.bf16.gmra.mxu2 %v401_v31  ;;  %688 = vmatmul.bf16.gmra.mxu0 %v401_v31  ;;  %1400 = vtanh.f32 %v338_v35 }
  0xb7   : > { %639 = vmatmul.bf16.gmra.mxu3 %v402_v33  ;;  %737 = vmatmul.bf16.gmra.mxu1 %v402_v33  ;;  %v311_v33 = vadd.f32 %v310_v25, %v1711_v5 }
  0xb9   : > { %v357_v18 = vpop.f32.mrf.mxu3 }
  0xba   : > { %v290_v36 = vpop.f32.mrf.mxu0  ;;  %v339_v38 = vpop.f32.mrf.mxu1  ;;  %v358_v30 = vadd.f32 %v357_v18, %v1713_v7 }
  0xbb   : > { %v291_v37 = vadd.f32 %v290_v36, %v1711_v5  ;;  %v340_v39 = vadd.f32 %v339_v38, %v1713_v7  ;;  %v1399_v41 = vpop.eup %1398 }
  0xbc   : > { %v1401_v42 = vpop.eup %1400  ;;  %v313_v35 = vpop.f32.mrf.mxu2 }
  0xbd   : > { %1402 = vtanh.f32 %v291_v37 }
  0xbe   : > { %1404 = vtanh.f32 %v340_v39 }
  0xc1   : > { %v359_v23 = vpop.f32.mrf.mxu3 }
  0xc2   : > { %v293_v43 = vpop.f32.mrf.mxu0  ;;  %v342_v45 = vpop.f32.mrf.mxu1  ;;  %v360_v31 = vadd.f32 %v359_v23, %v1713_v7 }
  0xc3   : > { %v1403_v44 = vpop.eup %1402  ;;  %v294_v50 = vadd.f32 %v293_v43, %v1711_v5  ;;  %v343_v52 = vadd.f32 %v342_v45, %v1713_v7 }
  0xc4   : > { %v1405_v47 = vpop.eup %1404  ;;  %v403_v48 = vpack.c.bf16 %v1403_v44, %v1399_v41  ;;  %v315_v43 = vpop.f32.mrf.mxu2 }
  0xc5   : > { %v404_v49 = vpack.c.bf16 %v1405_v47, %v1401_v42  ;;  %1406 = vtanh.f32 %v294_v50  ;;  %v314_v42 = vadd.f32 %v313_v35, %v1711_v5 }
  0xc6   : > { %595 = vmatmul.bf16.gmra.mxu2 %v403_v48  ;;  %693 = vmatmul.bf16.gmra.mxu0 %v403_v48  ;;  %1408 = vtanh.f32 %v343_v52  ;;  %v316_v48 = vadd.f32 %v315_v43, %v1711_v5 }
  0xc7   : > { %644 = vmatmul.bf16.gmra.mxu3 %v404_v49  ;;  %742 = vmatmul.bf16.gmra.mxu1 %v404_v49 }
  0xc9   : > { %v362_v34 = vpop.f32.mrf.mxu3 }
  0xca   : > { %v295_v53 = vpop.f32.mrf.mxu0  ;;  %v344_v55 = vpop.f32.mrf.mxu1  ;;  %v363_v45 = vadd.f32 %v362_v34, %v1713_v7 }
  0xcb   : > { %v296_v54 = vadd.f32 %v295_v53, %v1711_v5  ;;  %v345_v56 = vadd.f32 %v344_v55, %v1713_v7  ;;  %v1407_v57 = vpop.eup %1406  ;;  %v226_v55 = vld [vmem:[#allocation2 + $0x120] sm:$0x11] }
  0xcc   : > { %v1409_v59 = vpop.eup %1408 }
  0xcd   : > { %1410 = vtanh.f32 %v296_v54 }
  0xce   : > { %1412 = vtanh.f32 %v345_v56  ;;  %v228_v56 = vunpack.c.h.bf16 %v226_v55 }
  0xcf   : > { %1414 = vtanh.f32 %v348_v2  ;;  %v1754_v2 = vld [vmem:[#allocation2 + $0x130] sm:$0x11] }
  0xd0   : > { %1416 = vtanh.f32 %v350_v4  ;;  %v231_v46 = vunpack.c.h.bf16 %v1754_v2 }
  0xd1   : > { %v364_v41 = vpop.f32.mrf.mxu3 }
  0xd2   : > { %v298_v60 = vpop.f32.mrf.mxu0  ;;  %v365_v47 = vadd.f32 %v364_v41, %v1713_v7  ;;  %v1748_v7 = vperm.slane %v228_v56, 0 }
  0xd3   : > { %v1411_v62 = vpop.eup %1410  ;;  %v299_v6 = vadd.f32 %v298_v60, %v1711_v5 }
  0xd4   : > { %v1413_v0 = vpop.eup %1412  ;;  %v405_v1 = vpack.c.bf16 %v1411_v62, %v1407_v57 }
  0xd5   : > { %v406_v3 = vpack.c.bf16 %v1413_v0, %v1409_v59  ;;  %1418 = vtanh.f32 %v299_v6  ;;  %v1415_v9 = vpop.eup %1414 }
  0xd6   : > { %600 = vmatmul.bf16.gmra.mxu2 %v405_v1  ;;  %698 = vmatmul.bf16.gmra.mxu0 %v405_v1  ;;  %v1417_v10 = vpop.eup %1416 }
  0xd7   : > { %649 = vmatmul.bf16.gmra.mxu3 %v406_v3  ;;  %747 = vmatmul.bf16.gmra.mxu1 %v406_v3  ;;  %v408_v13 = vpack.c.bf16 %v1417_v10, %v1415_v9 }
  0xda   : > { %v300_v32 = vpop.f32.mrf.mxu0 }
  0xdb   : > { %v301_v8 = vadd.f32 %v300_v32, %v1711_v5  ;;  %v1419_v11 = vpop.eup %1418  ;;  %v227_v5 = vunpack.c.l.bf16 %v226_v55 }
  0xdd   : > { %1420 = vtanh.f32 %v301_v8  ;;  %v1751_v60 = vperm.slane %v227_v5, 0  ;;  %v230_v8 = vunpack.c.l.bf16 %v1754_v2 }
  0xde   : > { %1422 = vtanh.f32 %v304_v15 }
  0xdf   : > { %1424 = vtanh.f32 %v353_v17  ;;  %v1761_v10 = vperm.slane %v230_v8, 0 }
  0xe0   : > { %1426 = vtanh.f32 %v355_v20 }
  0xe1   : > { %1428 = vtanh.f32 %v306_v21 }
  0xe2   : > { %1430 = vtanh.f32 %v309_v28 }
  0xe3   : > { %v1421_v12 = vpop.eup %1420  ;;  %1432 = vtanh.f32 %v358_v30 }
  0xe4   : > { %v407_v16 = vpack.c.bf16 %v1421_v12, %v1419_v11  ;;  %v1423_v14 = vpop.eup %1422  ;;  %1434 = vtanh.f32 %v360_v31  ;;  %v1763_v11 = vperm.slane %v231_v46, 0 }
  0xe5   : > { %v1425_v22 = vpop.eup %1424  ;;  %1436 = vtanh.f32 %v311_v33 }
  0xe6   : > { %605 = vmatmul.bf16.gmra.mxu2 %v407_v16  ;;  %703 = vmatmul.bf16.gmra.mxu0 %v407_v16  ;;  %v1427_v24 = vpop.eup %1426  ;;  %1438 = vtanh.f32 %v314_v42 }
  0xe7   : > { %654 = vmatmul.bf16.gmra.mxu3 %v408_v13  ;;  %752 = vmatmul.bf16.gmra.mxu1 %v408_v13  ;;  %v1429_v26 = vpop.eup %1428  ;;  %v410_v27 = vpack.c.bf16 %v1427_v24, %v1425_v22  ;;  %1440 = vtanh.f32 %v363_v45 }
  0xe8   : > { %v409_v29 = vpack.c.bf16 %v1429_v26, %v1423_v14  ;;  %v1431_v36 = vpop.eup %1430  ;;  %1442 = vtanh.f32 %v365_v47 }
  0xe9   : > { %v1433_v37 = vpop.eup %1432  ;;  %1444 = vtanh.f32 %v316_v48 }
  0xea   : > { %v1435_v38 = vpop.eup %1434 }
  0xeb   : > { %v1437_v39 = vpop.eup %1436  ;;  %v412_v40 = vpack.c.bf16 %v1435_v38, %v1433_v37 }
  0xec   : > { %v411_v44 = vpack.c.bf16 %v1437_v39, %v1431_v36  ;;  %v1439_v49 = vpop.eup %1438 }
  0xed   : > { %v1441_v50 = vpop.eup %1440 }
  0xee   : > { %v1443_v51 = vpop.eup %1442 }
  0xef   : > { %v1445_v52 = vpop.eup %1444  ;;  %v414_v53 = vpack.c.bf16 %v1443_v51, %v1441_v50 }
  0xf0   : > { %v413_v54 = vpack.c.bf16 %v1445_v52, %v1439_v49 }
  0xf6   : > { %610 = vmatmul.bf16.gmra.mxu2 %v409_v29  ;;  %708 = vmatmul.bf16.gmra.mxu0 %v409_v29 }
  0xf7   : > { %659 = vmatmul.bf16.gmra.mxu3 %v410_v27  ;;  %757 = vmatmul.bf16.gmra.mxu1 %v410_v27 }
 0x106   : > { %615 = vmatmul.bf16.gmra.mxu2 %v411_v44  ;;  %713 = vmatmul.bf16.gmra.mxu0 %v411_v44 }
 0x107   : > { %664 = vmatmul.bf16.gmra.mxu3 %v412_v40  ;;  %762 = vmatmul.bf16.gmra.mxu1 %v412_v40 }
 0x116   : > { %620 = vmatmul.bf16.gmra.mxu2 %v413_v54 }
 0x117   : > { %669 = vmatmul.bf16.gmra.mxu3 %v414_v53  ;;  %767 = vmatmul.bf16.gmra.mxu1 %v414_v53 }
 0x123   : > { %v684_v57 = vpop.f32.mrf.mxu0 }
 0x124   : > { %v685_v58 = vadd.f32 %v684_v57, %v1748_v7  ;;  %v733_v59 = vpop.f32.mrf.mxu1 }
 0x126   : > { %718 = vmatmul.bf16.vlgmr.msra.gmra.mxu2 %v413_v54  ;;  %v734_v61 = vadd.f32 %v733_v59, %v685_v58 }
 0x128   : > { %1446 = vtanh.f32 %v734_v61 }
 0x129   : > { %v586_v62 = vpop.f32.mrf.mxu2 }
 0x12a   : > { %v587_v0 = vadd.f32 %v586_v62, %v1751_v60  ;;  %v635_v1 = vpop.f32.mrf.mxu3 }
 0x12b   : > { %v686_v3 = vpop.f32.mrf.mxu0 }
 0x12c   : > { %v636_v4 = vadd.f32 %v635_v1, %v587_v0  ;;  %v687_v6 = vadd.f32 %v686_v3, %v1748_v7  ;;  %v735_v32 = vpop.f32.mrf.mxu1 }
 0x12e   : > { %1448 = vtanh.f32 %v636_v4  ;;  %v736_v63 = vadd.f32 %v735_v32, %v687_v6  ;;  %v1447_v12 = vpop.eup %1446 }
 0x12f   : > { %v808_v14 = vmul.f32 %v1447_v12, %v1763_v11 }
 0x130   : > { %1450 = vtanh.f32 %v736_v63 }
 0x131   : > { %v588_v9 = vpop.f32.mrf.mxu2 }
 0x132   : > { %v589_v13 = vadd.f32 %v588_v9, %v1751_v60  ;;  %v637_v15 = vpop.f32.mrf.mxu3 }
 0x133   : > { %v689_v16 = vpop.f32.mrf.mxu0 }
 0x134   : > { %v1449_v17 = vpop.eup %1448  ;;  %v638_v18 = vadd.f32 %v637_v15, %v589_v13  ;;  %v690_v19 = vadd.f32 %v689_v16, %v1748_v7  ;;  %v738_v20 = vpop.f32.mrf.mxu1 }
 0x135   : > { %v807_v21 = vmul.f32 %v1449_v17, %v1761_v10 }
 0x136   : > { %1452 = vtanh.f32 %v638_v18  ;;  %v739_v23 = vadd.f32 %v738_v20, %v690_v19  ;;  %v1451_v25 = vpop.eup %1450 }
 0x137   : > { %v839_v22 = vadd.f32 %v808_v14, %v807_v21  ;;  %v810_v35 = vmul.f32 %v1451_v25, %v1763_v11 }
 0x138   : > { %1454 = vtanh.f32 %v739_v23 }
 0x139   : > { %v591_v24 = vpop.f32.mrf.mxu2  ;;  %840 = vadd.xlane.f32.xlu0 %v839_v22 }
 0x13a   : > { %v592_v26 = vadd.f32 %v591_v24, %v1751_v60  ;;  %v640_v27 = vpop.f32.mrf.mxu3 }
 0x13b   : > { %v691_v28 = vpop.f32.mrf.mxu0 }
 0x13c   : > { %v1453_v29 = vpop.eup %1452  ;;  %v641_v30 = vadd.f32 %v640_v27, %v592_v26  ;;  %v692_v31 = vadd.f32 %v691_v28, %v1748_v7  ;;  %v740_v33 = vpop.f32.mrf.mxu1 }
 0x13d   : > { %v809_v34 = vmul.f32 %v1453_v29, %v1761_v10 }
 0x13e   : > { %1456 = vtanh.f32 %v641_v30  ;;  %v741_v37 = vadd.f32 %v740_v33, %v692_v31  ;;  %v1455_v39 = vpop.eup %1454 }
 0x13f   : > { %v842_v36 = vadd.f32 %v810_v35, %v809_v34  ;;  %v812_v49 = vmul.f32 %v1455_v39, %v1763_v11 }
 0x140   : > { %1458 = vtanh.f32 %v741_v37 }
 0x141   : > { %v593_v38 = vpop.f32.mrf.mxu2  ;;  %843 = vadd.xlane.f32.xlu0 %v842_v36 }
 0x142   : > { %v594_v40 = vadd.f32 %v593_v38, %v1751_v60  ;;  %v642_v41 = vpop.f32.mrf.mxu3 }
 0x143   : > { %v694_v42 = vpop.f32.mrf.mxu0 }
 0x144   : > { %v1457_v43 = vpop.eup %1456  ;;  %v643_v44 = vadd.f32 %v642_v41, %v594_v40  ;;  %v695_v45 = vadd.f32 %v694_v42, %v1748_v7  ;;  %v743_v47 = vpop.f32.mrf.mxu1 }
 0x145   : > { %v811_v48 = vmul.f32 %v1457_v43, %v1761_v10 }
 0x146   : > { %1460 = vtanh.f32 %v643_v44  ;;  %v744_v51 = vadd.f32 %v743_v47, %v695_v45  ;;  %v1459_v53 = vpop.eup %1458 }
 0x147   : > { %v845_v50 = vadd.f32 %v812_v49, %v811_v48  ;;  %v814_v62 = vmul.f32 %v1459_v53, %v1763_v11 }
 0x148   : > { %1462 = vtanh.f32 %v744_v51 }
 0x149   : > { %v596_v52 = vpop.f32.mrf.mxu2  ;;  %846 = vadd.xlane.f32.xlu1 %v845_v50 }
 0x14a   : > { %v597_v54 = vadd.f32 %v596_v52, %v1751_v60  ;;  %v645_v55 = vpop.f32.mrf.mxu3 }
 0x14b   : > { %v696_v56 = vpop.f32.mrf.mxu0 }
 0x14c   : > { %v1461_v5 = vpop.eup %1460  ;;  %v646_v57 = vadd.f32 %v645_v55, %v597_v54  ;;  %v697_v58 = vadd.f32 %v696_v56, %v1748_v7  ;;  %v745_v59 = vpop.f32.mrf.mxu1 }
 0x14d   : > { %v813_v61 = vmul.f32 %v1461_v5, %v1761_v10 }
 0x14e   : > { %1464 = vtanh.f32 %v646_v57  ;;  %v746_v1 = vadd.f32 %v745_v59, %v697_v58  ;;  %v1463_v4 = vpop.eup %1462 }
 0x14f   : > { %v848_v0 = vadd.f32 %v814_v62, %v813_v61  ;;  %v816_v16 = vmul.f32 %v1463_v4, %v1763_v11 }
 0x150   : > { %1466 = vtanh.f32 %v746_v1 }
 0x151   : > { %v598_v3 = vpop.f32.mrf.mxu2  ;;  %849 = vadd.xlane.f32.xlu1 %v848_v0 }
 0x152   : > { %v599_v6 = vadd.f32 %v598_v3, %v1751_v60  ;;  %v647_v32 = vpop.f32.mrf.mxu3 }
 0x153   : > { %v699_v46 = vpop.f32.mrf.mxu0 }
 0x154   : > { %v1465_v63 = vpop.eup %1464  ;;  %v648_v9 = vadd.f32 %v647_v32, %v599_v6  ;;  %v700_v12 = vadd.f32 %v699_v46, %v1748_v7  ;;  %v748_v13 = vpop.f32.mrf.mxu1 }
 0x155   : > { %v815_v15 = vmul.f32 %v1465_v63, %v1761_v10 }
 0x156   : > { %1468 = vtanh.f32 %v648_v9  ;;  %v749_v18 = vadd.f32 %v748_v13, %v700_v12  ;;  %v1467_v20 = vpop.eup %1466 }
 0x157   : > { %v851_v17 = vadd.f32 %v816_v16, %v815_v15  ;;  %v818_v28 = vmul.f32 %v1467_v20, %v1763_v11 }
 0x158   : > { %1470 = vtanh.f32 %v749_v18 }
 0x159   : > { %v601_v19 = vpop.f32.mrf.mxu2  ;;  %852 = vadd.xlane.f32.xlu2 %v851_v17 }
 0x15a   : > { %v602_v21 = vadd.f32 %v601_v19, %v1751_v60  ;;  %v650_v14 = vpop.f32.mrf.mxu3 }
 0x15b   : > { %v701_v22 = vpop.f32.mrf.mxu0 }
 0x15c   : > { %v1469_v23 = vpop.eup %1468  ;;  %v651_v24 = vadd.f32 %v650_v14, %v602_v21  ;;  %v702_v25 = vadd.f32 %v701_v22, %v1748_v7  ;;  %v750_v26 = vpop.f32.mrf.mxu1 }
 0x15d   : > { %v817_v27 = vmul.f32 %v1469_v23, %v1761_v10 }
 0x15e   : > { %1472 = vtanh.f32 %v651_v24  ;;  %v751_v30 = vadd.f32 %v750_v26, %v702_v25  ;;  %v1471_v33 = vpop.eup %1470 }
 0x15f   : > { %v854_v29 = vadd.f32 %v818_v28, %v817_v27  ;;  %v820_v42 = vmul.f32 %v1471_v33, %v1763_v11 }
 0x160   : > { %1474 = vtanh.f32 %v751_v30 }
 0x161   : > { %v603_v31 = vpop.f32.mrf.mxu2  ;;  %855 = vadd.xlane.f32.xlu2 %v854_v29 }
 0x162   : > { %v604_v34 = vadd.f32 %v603_v31, %v1751_v60  ;;  %v652_v35 = vpop.f32.mrf.mxu3 }
 0x163   : > { %v704_v36 = vpop.f32.mrf.mxu0 }
 0x164   : > { %v1473_v37 = vpop.eup %1472  ;;  %v653_v38 = vadd.f32 %v652_v35, %v604_v34  ;;  %v705_v39 = vadd.f32 %v704_v36, %v1748_v7  ;;  %v753_v40 = vpop.f32.mrf.mxu1 }
 0x165   : > { %v819_v41 = vmul.f32 %v1473_v37, %v1761_v10 }
 0x166   : > { %1476 = vtanh.f32 %v653_v38  ;;  %v754_v44 = vadd.f32 %v753_v40, %v705_v39  ;;  %v1475_v47 = vpop.eup %1474 }
 0x167   : > { %v857_v43 = vadd.f32 %v820_v42, %v819_v41  ;;  %v822_v56 = vmul.f32 %v1475_v47, %v1763_v11 }
 0x168   : > { %1478 = vtanh.f32 %v754_v44 }
 0x169   : > { %v606_v45 = vpop.f32.mrf.mxu2  ;;  %858 = vadd.xlane.f32.xlu0 %v857_v43 }
 0x16a   : > { %v607_v48 = vadd.f32 %v606_v45, %v1751_v60  ;;  %v655_v49 = vpop.f32.mrf.mxu3 }
 0x16b   : > { %v706_v50 = vpop.f32.mrf.mxu0 }
 0x16c   : > { %v1477_v51 = vpop.eup %1476  ;;  %v656_v52 = vadd.f32 %v655_v49, %v607_v48  ;;  %v707_v53 = vadd.f32 %v706_v50, %v1748_v7  ;;  %v755_v54 = vpop.f32.mrf.mxu1 }
 0x16d   : > { %v821_v55 = vmul.f32 %v1477_v51, %v1761_v10 }
 0x16e   : > { %1480 = vtanh.f32 %v656_v52  ;;  %v756_v57 = vadd.f32 %v755_v54, %v707_v53  ;;  %v1479_v59 = vpop.eup %1478 }
 0x16f   : > { %v860_v5 = vadd.f32 %v822_v56, %v821_v55  ;;  %v824_v46 = vmul.f32 %v1479_v59, %v1763_v11 }
 0x170   : > { %1482 = vtanh.f32 %v756_v57 }
 0x171   : > { %v608_v58 = vpop.f32.mrf.mxu2  ;;  %861 = vadd.xlane.f32.xlu1 %v860_v5 }
 0x172   : > { %v609_v61 = vadd.f32 %v608_v58, %v1751_v60  ;;  %v657_v62 = vpop.f32.mrf.mxu3 }
 0x173   : > { %v709_v0 = vpop.f32.mrf.mxu0 }
 0x174   : > { %v1481_v1 = vpop.eup %1480  ;;  %v658_v3 = vadd.f32 %v657_v62, %v609_v61  ;;  %v710_v4 = vadd.f32 %v709_v0, %v1748_v7  ;;  %v758_v6 = vpop.f32.mrf.mxu1 }
 0x175   : > { %v823_v32 = vmul.f32 %v1481_v1, %v1761_v10 }
 0x176   : > { %1484 = vtanh.f32 %v658_v3  ;;  %v759_v9 = vadd.f32 %v758_v6, %v710_v4  ;;  %v1483_v13 = vpop.eup %1482 }
 0x177   : > { %v863_v63 = vadd.f32 %v824_v46, %v823_v32  ;;  %v826_v22 = vmul.f32 %v1483_v13, %v1763_v11  ;;  %v1619_v46 = vmov 0  }
 0x178   : > { %1486 = vtanh.f32 %v759_v9  ;;  %1379 = vset.pattern.permute.xlu1 %v1619_v46  ;;  %1380 = vset.pattern.permute.xlu2 %v1619_v46 }
 0x179   : > { %v611_v12 = vpop.f32.mrf.mxu2  ;;  %864 = vadd.xlane.f32.xlu2 %v863_v63  ;;  %1381 = vset.pattern.permute.xlu0 %v1619_v46 }
 0x17a   : > { %v612_v15 = vadd.f32 %v611_v12, %v1751_v60  ;;  %v660_v16 = vpop.f32.mrf.mxu3 }
 0x17b   : > { %v711_v17 = vpop.f32.mrf.mxu0 }
 0x17c   : > { %v1485_v18 = vpop.eup %1484  ;;  %v661_v19 = vadd.f32 %v660_v16, %v612_v15  ;;  %v712_v20 = vadd.f32 %v711_v17, %v1748_v7  ;;  %v760_v21 = vpop.f32.mrf.mxu1  ;;  %v1821_v16 = vperm.slane %v230_v8, 1 }
 0x17d   : > { %v825_v14 = vmul.f32 %v1485_v18, %v1761_v10 }
 0x17e   : > { %1488 = vtanh.f32 %v661_v19  ;;  %v761_v24 = vadd.f32 %v760_v21, %v712_v20  ;;  %v1487_v26 = vpop.eup %1486 }
 0x17f   : > { %v866_v23 = vadd.f32 %v826_v22, %v825_v14  ;;  %v828_v36 = vmul.f32 %v1487_v26, %v1763_v11 }
 0x180   : > { %1490 = vtanh.f32 %v761_v24 }
 0x181   : > { %v613_v25 = vpop.f32.mrf.mxu2  ;;  %867 = vadd.xlane.f32.xlu0 %v866_v23 }
 0x182   : > { %v614_v27 = vadd.f32 %v613_v25, %v1751_v60  ;;  %v662_v28 = vpop.f32.mrf.mxu3 }
 0x183   : > { %v714_v29 = vpop.f32.mrf.mxu0 }
 0x184   : > { %v1489_v30 = vpop.eup %1488  ;;  %v663_v31 = vadd.f32 %v662_v28, %v614_v27  ;;  %v715_v33 = vadd.f32 %v714_v29, %v1748_v7  ;;  %v763_v34 = vpop.f32.mrf.mxu1 }
 0x185   : > { %v827_v35 = vmul.f32 %v1489_v30, %v1761_v10 }
 0x186   : > { %1492 = vtanh.f32 %v663_v31  ;;  %v764_v38 = vadd.f32 %v763_v34, %v715_v33  ;;  %v1491_v40 = vpop.eup %1490 }
 0x187   : > { %v869_v37 = vadd.f32 %v828_v36, %v827_v35  ;;  %v830_v50 = vmul.f32 %v1491_v40, %v1763_v11 }
 0x188   : > { %1494 = vtanh.f32 %v764_v38 }
 0x189   : > { %v616_v39 = vpop.f32.mrf.mxu2  ;;  %870 = vadd.xlane.f32.xlu1 %v869_v37 }
 0x18a   : > { %v617_v41 = vadd.f32 %v616_v39, %v1751_v60  ;;  %v665_v42 = vpop.f32.mrf.mxu3 }
 0x18b   : > { %v716_v43 = vpop.f32.mrf.mxu0 }
 0x18c   : > { %v1493_v44 = vpop.eup %1492  ;;  %v666_v45 = vadd.f32 %v665_v42, %v617_v41  ;;  %v717_v47 = vadd.f32 %v716_v43, %v1748_v7  ;;  %v765_v48 = vpop.f32.mrf.mxu1 }
 0x18d   : > { %v829_v49 = vmul.f32 %v1493_v44, %v1761_v10 }
 0x18e   : > { %1496 = vtanh.f32 %v666_v45  ;;  %v766_v52 = vadd.f32 %v765_v48, %v717_v47  ;;  %v1495_v54 = vpop.eup %1494 }
 0x18f   : > { %v872_v51 = vadd.f32 %v830_v50, %v829_v49  ;;  %v832_v59 = vmul.f32 %v1495_v54, %v1763_v11 }
 0x190   : > { %1498 = vtanh.f32 %v766_v52 }
 0x191   : > { %v618_v53 = vpop.f32.mrf.mxu2  ;;  %873 = vadd.xlane.f32.xlu2 %v872_v51 }
 0x192   : > { %v619_v55 = vadd.f32 %v618_v53, %v1751_v60  ;;  %v667_v56 = vpop.f32.mrf.mxu3 }
 0x194   : > { %v1497_v5 = vpop.eup %1496  ;;  %v668_v57 = vadd.f32 %v667_v56, %v619_v55  ;;  %v768_v13 = vpop.f32.mrf.mxu1 }
 0x195   : > { %v831_v58 = vmul.f32 %v1497_v5, %v1761_v10 }
 0x196   : > { %1500 = vtanh.f32 %v668_v57  ;;  %v1499_v0 = vpop.eup %1498 }
 0x197   : > { %v875_v61 = vadd.f32 %v832_v59, %v831_v58  ;;  %v834_v4 = vmul.f32 %v1499_v0, %v1763_v11 }
 0x199   : > { %v621_v62 = vpop.f32.mrf.mxu2  ;;  %876 = vadd.xlane.f32.xlu0 %v875_v61 }
 0x19a   : > { %v670_v63 = vpop.f32.mrf.mxu3  ;;  %v622_v9 = vadd.f32 %v621_v62, %v1751_v60 }
 0x19c   : > { %v1501_v1 = vpop.eup %1500  ;;  %v671_v12 = vadd.f32 %v670_v63, %v622_v9  ;;  %v770_v8 = vpop.f32.mrf.mxu1 }
 0x19d   : > { %v833_v3 = vmul.f32 %v1501_v1, %v1761_v10 }
 0x19e   : > { %1502 = vtanh.f32 %v671_v12 }
 0x19f   : > { %v878_v6 = vadd.f32 %v834_v4, %v833_v3 }
 0x1a1   : > { %v623_v32 = vpop.f32.mrf.mxu2  ;;  %879 = vadd.xlane.f32.xlu1 %v878_v6 }
 0x1a2   : > { %v624_v18 = vadd.f32 %v623_v32, %v1751_v60  ;;  %v672_v21 = vpop.f32.mrf.mxu3 }
 0x1a4   : > { %v673_v23 = vadd.f32 %v672_v21, %v624_v18  ;;  %v1503_v26 = vpop.eup %1502 }
 0x1a5   : > { %v835_v30 = vmul.f32 %v1503_v26, %v1761_v10 }
 0x1a9   : > { %v719_v15 = vpop.f32.mrf.mxu2 }
 0x1aa   : > { %v720_v17 = vadd.f32 %v719_v15, %v1748_v7 }
 0x1ac   : > { %v769_v19 = vadd.f32 %v768_v13, %v720_v17  ;;  %v841_v20 = vpop.xlane.xlu0 %840 }
 0x1ad   : > { %v888_v14 = vadd.f32 %v1821_v16, %v841_v20 }
 0x1ae   : > { %1504 = vtanh.f32 %v769_v19 }
 0x1af   : > { %v904_v22 = vsub.f32 0.0, %v888_v14 }
 0x1b1   : > { %v920_v24 = vmul.f32 1.442695, %v904_v22  ;;  %v721_v25 = vpop.f32.mrf.mxu2 }
 0x1b2   : > { %v722_v2 = vadd.f32 %v721_v25, %v1748_v7 }
 0x1b3   : > { %1506 = vpow2.f32 %v920_v24 }
 0x1b4   : > { %v1505_v27 = vpop.eup %1504  ;;  %1508 = vtanh.f32 %v673_v23  ;;  %v771_v28 = vadd.f32 %v770_v8, %v722_v2  ;;  %v844_v29 = vpop.xlane.xlu0 %843 }
 0x1b5   : > { %v889_v60 = vadd.f32 %v1821_v16, %v844_v29  ;;  %v836_v31 = vmul.f32 %v1505_v27, %v1763_v11 }
 0x1b6   : > { %1510 = vtanh.f32 %v771_v28 }
 0x1b7   : > { %v905_v33 = vsub.f32 0.0, %v889_v60  ;;  %v881_v34 = vadd.f32 %v836_v31, %v835_v30 }
 0x1b9   : > { %v1507_v35 = vpop.eup %1506  ;;  %v922_v36 = vmul.f32 1.442695, %v905_v33  ;;  %882 = vadd.xlane.f32.xlu2 %v881_v34 }
 0x1ba   : > { %v1509_v37 = vpop.eup %1508  ;;  %v952_v7 = vadd.f32 1.0, %v1507_v35 }
 0x1bb   : > { %v837_v41 = vmul.f32 %v1509_v37, %v1761_v10 }
 0x1bc   : > { %v1511_v38 = vpop.eup %1510  ;;  %1512 = vrcp.f32 %v952_v7  ;;  %v847_v39 = vpop.xlane.xlu1 %846 }
 0x1bd   : > { %1514 = vpow2.f32 %v922_v36  ;;  %v890_v40 = vadd.f32 %v1821_v16, %v847_v39  ;;  %v838_v42 = vmul.f32 %v1511_v38, %v1763_v11 }
 0x1bf   : > { %v906_v43 = vsub.f32 0.0, %v890_v40  ;;  %v884_v44 = vadd.f32 %v838_v42, %v837_v41 }
 0x1c1   : > { %v924_v45 = vmul.f32 1.442695, %v906_v43  ;;  %885 = vadd.xlane.f32.xlu0 %v884_v44 }
 0x1c2   : > { %v1513_v47 = vpop.eup %1512 }
 0x1c3   : > { %v1515_v48 = vpop.eup %1514  ;;  %1516 = vpow2.f32 %v924_v45  ;;  %986 = vperm.xlu1 %1379, %v1513_v47  }
 0x1c4   : > { %v850_v49 = vpop.xlane.xlu1 %849  ;;  %v953_v51 = vadd.f32 1.0, %v1515_v48 }
 0x1c5   : > { %v891_v50 = vadd.f32 %v1821_v16, %v850_v49 }
 0x1c6   : > { %1518 = vrcp.f32 %v953_v51 }
 0x1c7   : > { %v907_v52 = vsub.f32 0.0, %v891_v50 }
 0x1c9   : > { %v1517_v53 = vpop.eup %1516  ;;  %v926_v54 = vmul.f32 1.442695, %v907_v52 }
 0x1ca   : > { %v954_v55 = vadd.f32 1.0, %v1517_v53 }
 0x1cb   : > { %1520 = vpow2.f32 %v926_v54 }
 0x1cc   : > { %v853_v10 = vpop.xlane.xlu2 %852  ;;  %1522 = vrcp.f32 %v954_v55  ;;  %v1519_v5 = vpop.eup %1518 }
 0x1cd   : > { %v892_v11 = vadd.f32 %v1821_v16, %v853_v10 }
 0x1cf   : > { %v908_v56 = vsub.f32 0.0, %v892_v11 }
 0x1d1   : > { %v1521_v57 = vpop.eup %1520  ;;  %v928_v58 = vmul.f32 1.442695, %v908_v56  ;;  %991 = vperm.xlu2 %1380, %v1519_v5  }
 0x1d2   : > { %v955_v59 = vadd.f32 1.0, %v1521_v57  ;;  %v1523_v61 = vpop.eup %1522 }
 0x1d3   : > { %1524 = vpow2.f32 %v928_v58 }
 0x1d4   : > { %1526 = vrcp.f32 %v955_v59  ;;  %v856_v62 = vpop.xlane.xlu2 %855 }
 0x1d5   : > { %v893_v0 = vadd.f32 %v1821_v16, %v856_v62  ;;  %996 = vperm.xlu0 %1381, %v1523_v61  }
 0x1d7   : > { %v909_v1 = vsub.f32 0.0, %v893_v0 }
 0x1d9   : > { %v1525_v3 = vpop.eup %1524  ;;  %v930_v4 = vmul.f32 1.442695, %v909_v1 }
 0x1da   : > { %v1527_v6 = vpop.eup %1526  ;;  %v956_v32 = vadd.f32 1.0, %v1525_v3 }
 0x1db   : > { %1528 = vpow2.f32 %v930_v4  ;;  %1001 = vperm.xlu2 %1380, %v1527_v6  }
 0x1dc   : > { %1530 = vrcp.f32 %v956_v32  ;;  %v859_v46 = vpop.xlane.xlu0 %858 }
 0x1dd   : > { %v894_v63 = vadd.f32 %v1821_v16, %v859_v46 }
 0x1df   : > { %v910_v9 = vsub.f32 0.0, %v894_v63 }
 0x1e1   : > { %v1529_v12 = vpop.eup %1528  ;;  %v932_v13 = vmul.f32 1.442695, %v910_v9 }
 0x1e2   : > { %v1531_v15 = vpop.eup %1530  ;;  %v957_v17 = vadd.f32 1.0, %v1529_v12 }
 0x1e3   : > { %1532 = vpow2.f32 %v932_v13  ;;  %1006 = vperm.xlu1 %1379, %v1531_v15  }
 0x1e4   : > { %1534 = vrcp.f32 %v957_v17  ;;  %v862_v18 = vpop.xlane.xlu1 %861 }
 0x1e5   : > { %v895_v19 = vadd.f32 %v1821_v16, %v862_v18 }
 0x1e7   : > { %v911_v20 = vsub.f32 0.0, %v895_v19 }
 0x1e9   : > { %v1533_v21 = vpop.eup %1532  ;;  %v934_v14 = vmul.f32 1.442695, %v911_v20 }
 0x1ea   : > { %v1535_v22 = vpop.eup %1534  ;;  %v958_v23 = vadd.f32 1.0, %v1533_v21 }
 0x1eb   : > { %1536 = vpow2.f32 %v934_v14  ;;  %1011 = vperm.xlu2 %1380, %v1535_v22  }
 0x1ec   : > { %1538 = vrcp.f32 %v958_v23  ;;  %v865_v24 = vpop.xlane.xlu2 %864 }
 0x1ed   : > { %v896_v25 = vadd.f32 %v1821_v16, %v865_v24 }
 0x1ef   : > { %v912_v26 = vsub.f32 0.0, %v896_v25 }
 0x1f1   : > { %v1537_v2 = vpop.eup %1536  ;;  %v936_v8 = vmul.f32 1.442695, %v912_v26 }
 0x1f2   : > { %v1539_v27 = vpop.eup %1538  ;;  %v959_v28 = vadd.f32 1.0, %v1537_v2 }
 0x1f3   : > { %1540 = vpow2.f32 %v936_v8  ;;  %1016 = vperm.xlu1 %1379, %v1539_v27  }
 0x1f4   : > { %1542 = vrcp.f32 %v959_v28  ;;  %v868_v29 = vpop.xlane.xlu0 %867 }
 0x1f5   : > { %v897_v60 = vadd.f32 %v1821_v16, %v868_v29 }
 0x1f7   : > { %v913_v30 = vsub.f32 0.0, %v897_v60 }
 0x1f9   : > { %v1541_v31 = vpop.eup %1540  ;;  %v938_v33 = vmul.f32 1.442695, %v913_v30 }
 0x1fa   : > { %v1543_v34 = vpop.eup %1542  ;;  %v960_v35 = vadd.f32 1.0, %v1541_v31 }
 0x1fb   : > { %1544 = vpow2.f32 %v938_v33  ;;  %1021 = vperm.xlu2 %1380, %v1543_v34  }
 0x1fc   : > { %1546 = vrcp.f32 %v960_v35  ;;  %v871_v36 = vpop.xlane.xlu1 %870 }
 0x1fd   : > { %v898_v37 = vadd.f32 %v1821_v16, %v871_v36 }
 0x1ff   : > { %v914_v7 = vsub.f32 0.0, %v898_v37 }
 0x201   : > { %v1545_v38 = vpop.eup %1544  ;;  %v940_v39 = vmul.f32 1.442695, %v914_v7 }
 0x202   : > { %v1547_v40 = vpop.eup %1546  ;;  %v961_v41 = vadd.f32 1.0, %v1545_v38 }
 0x203   : > { %1548 = vpow2.f32 %v940_v39  ;;  %1026 = vperm.xlu1 %1379, %v1547_v40  }
 0x204   : > { %1550 = vrcp.f32 %v961_v41  ;;  %v874_v42 = vpop.xlane.xlu2 %873 }
 0x205   : > { %v899_v43 = vadd.f32 %v1821_v16, %v874_v42 }
 0x207   : > { %v915_v44 = vsub.f32 0.0, %v899_v43 }
 0x209   : > { %v1549_v45 = vpop.eup %1548  ;;  %v942_v47 = vmul.f32 1.442695, %v915_v44 }
 0x20a   : > { %v1551_v48 = vpop.eup %1550  ;;  %v962_v49 = vadd.f32 1.0, %v1549_v45 }
 0x20b   : > { %1552 = vpow2.f32 %v942_v47  ;;  %1031 = vperm.xlu0 %1381, %v1551_v48  }
 0x20c   : > { %1554 = vrcp.f32 %v962_v49  ;;  %v877_v50 = vpop.xlane.xlu0 %876 }
 0x20d   : > { %v900_v51 = vadd.f32 %v1821_v16, %v877_v50 }
 0x20f   : > { %v916_v52 = vsub.f32 0.0, %v900_v51 }
 0x211   : > { %v1553_v53 = vpop.eup %1552  ;;  %v944_v54 = vmul.f32 1.442695, %v916_v52 }
 0x212   : > { %v1555_v55 = vpop.eup %1554  ;;  %v963_v10 = vadd.f32 1.0, %v1553_v53 }
 0x213   : > { %1556 = vpow2.f32 %v944_v54  ;;  %1036 = vperm.xlu2 %1380, %v1555_v55  }
 0x214   : > { %1558 = vrcp.f32 %v963_v10  ;;  %v880_v11 = vpop.xlane.xlu1 %879 }
 0x215   : > { %v901_v56 = vadd.f32 %v1821_v16, %v880_v11 }
 0x217   : > { %v917_v5 = vsub.f32 0.0, %v901_v56 }
 0x219   : > { %v1557_v57 = vpop.eup %1556  ;;  %v946_v58 = vmul.f32 1.442695, %v917_v5 }
 0x21a   : > { %v1559_v59 = vpop.eup %1558  ;;  %v964_v61 = vadd.f32 1.0, %v1557_v57 }
 0x21b   : > { %1560 = vpow2.f32 %v946_v58  ;;  %1041 = vperm.xlu1 %1379, %v1559_v59  }
 0x21c   : > { %1562 = vrcp.f32 %v964_v61 }
 0x221   : > { %v1561_v62 = vpop.eup %1560 }
 0x222   : > { %v1563_v0 = vpop.eup %1562  ;;  %v965_v1 = vadd.f32 1.0, %v1561_v62 }
 0x223   : > { %1046 = vperm.xlu0 %1381, %v1563_v0  }
 0x224   : > { %1564 = vrcp.f32 %v965_v1 }
 0x22a   : > { %v1565_v3 = vpop.eup %1564 }
 0x22b   : > { %1051 = vperm.xlu2 %1380, %v1565_v3  }
 0x22c   : > { %v883_v4 = vpop.xlane.xlu2 %882 }
 0x22d   : > { %v902_v6 = vadd.f32 %v1821_v16, %v883_v4 }
 0x22f   : > { %v918_v32 = vsub.f32 0.0, %v902_v6 }
 0x231   : > { %v948_v46 = vmul.f32 1.442695, %v918_v32 }
 0x233   : > { %1566 = vpow2.f32 %v948_v46 }
 0x234   : > { %v992_v63 = vpop.permute.xlu2 %991  ;;  %v886_v9 = vpop.xlane.xlu0 %885 }
 0x235   : > { %1065 = vst [vmem:[%s1850_s25 + $0x8] sm:$0xff] %v992_v63  ;;  %v903_v12 = vadd.f32 %v1821_v16, %v886_v9  ;;  %v987_v13 = vpop.permute.xlu1 %986 }
 0x236   : > { %1064 = vst [vmem:[%s1850_s25] sm:$0xff] %v987_v13 }
 0x237   : > { %v919_v15 = vsub.f32 0.0, %v903_v12 }
 0x239   : > { %v1567_v17 = vpop.eup %1566  ;;  %v950_v18 = vmul.f32 1.442695, %v919_v15 }
 0x23a   : > { %v966_v19 = vadd.f32 1.0, %v1567_v17 }
 0x23b   : > { %1568 = vpow2.f32 %v950_v18 }
 0x23c   : > { %1570 = vrcp.f32 %v966_v19  ;;  %v1002_v20 = vpop.permute.xlu2 %1001 }
 0x23d   : > { %1067 = vst [vmem:[%s1850_s25 + $0x18] sm:$0xff] %v1002_v20 }
 0x241   : > { %v1569_v21 = vpop.eup %1568 }
 0x242   : > { %v1571_v14 = vpop.eup %1570  ;;  %v967_v22 = vadd.f32 1.0, %v1569_v21 }
 0x243   : > { %1056 = vperm.xlu1 %1379, %v1571_v14  }
 0x244   : > { %1572 = vrcp.f32 %v967_v22 }
 0x245   : > { %v1012_v16 = vpop.permute.xlu2 %1011 }
 0x246   : > { %1069 = vst [vmem:[%s1850_s25 + $0x28] sm:$0xff] %v1012_v16 }
 0x247   : > { %v997_v23 = vpop.permute.xlu0 %996 }
 0x248   : > { %1066 = vst [vmem:[%s1850_s25 + $0x10] sm:$0xff] %v997_v23 }
 0x24a   : > { %v1573_v24 = vpop.eup %1572 }
 0x24b   : > { %1061 = vperm.xlu0 %1381, %v1573_v24  }
 0x255   : > { %v1007_v25 = vpop.permute.xlu1 %1006  ;;  %v1022_v26 = vpop.permute.xlu2 %1021 }
 0x256   : > { %1068 = vst [vmem:[%s1850_s25 + $0x20] sm:$0xff] %v1007_v25 }
 0x257   : > { %1071 = vst [vmem:[%s1850_s25 + $0x38] sm:$0xff] %v1022_v26 }
 0x265   : > { %v1017_v2 = vpop.permute.xlu1 %1016 }
 0x266   : > { %1070 = vst [vmem:[%s1850_s25 + $0x30] sm:$0xff] %v1017_v2 }
 0x26d   : > { %v1037_v8 = vpop.permute.xlu2 %1036 }
 0x26e   : > { %1074 = vst [vmem:[%s1850_s25 + $0x50] sm:$0xff] %v1037_v8 }
 0x275   : > { %v1027_v27 = vpop.permute.xlu1 %1026 }
 0x276   : > { %1072 = vst [vmem:[%s1850_s25 + $0x40] sm:$0xff] %v1027_v27 }
 0x27d   : > { %v1032_v28 = vpop.permute.xlu0 %1031 }
 0x27e   : > { %1073 = vst [vmem:[%s1850_s25 + $0x48] sm:$0xff] %v1032_v28 }
 0x285   : > { %v1052_v29 = vpop.permute.xlu2 %1051 }
 0x286   : > { %1077 = vst [vmem:[%s1850_s25 + $0x68] sm:$0xff] %v1052_v29 }
 0x28d   : > { %v1042_v60 = vpop.permute.xlu1 %1041 }
 0x28e   : > { %1075 = vst [vmem:[%s1850_s25 + $0x58] sm:$0xff] %v1042_v60 }
 0x295   : > { %v1047_v30 = vpop.permute.xlu0 %1046 }
 0x296   : > { %1076 = vst [vmem:[%s1850_s25 + $0x60] sm:$0xff] %v1047_v30 }
 0x2b5   : > { %v1057_v31 = vpop.permute.xlu1 %1056 }
 0x2b6   : > { %1078 = vst [vmem:[%s1850_s25 + $0x70] sm:$0xff] %v1057_v31 }
 0x2bd   : > { %v1062_v33 = vpop.permute.xlu0 %1061 }
 0x2be   : > { %1079 = vst [vmem:[%s1850_s25 + $0x78] sm:$0xff] %v1062_v33 }
 0x2bf PF: > { %s13_s9 = sadd.s32 1, %s1614_s9  }
 0x2c0   : > { %p10_p7 = scmp.ge.s32.totalorder %s13_s9, 4  }
 0x2c2   :  { %12 = sbr.rel (!%p10_p7) target bundleno = 1 (0x1), region = 63 }
 0x2c7   :  { %1102 = vsyncpa [#allocation3], 1 }
 0x2c8   :  { %1104 = vsyncpa [#allocation3 + $0x1], 1 }

</bundles_post_ra>
